<compile_context>
chip_gen: v5e
topology: v5e:2x2
jax: 0.10.0
libtpu: 0.0.40
codegen_flags: <defaults>
</compile_context>

<pallas_src>
import jax
import jax.numpy as jnp
from jax.experimental import pallas as pl
from jax.experimental.pallas import tpu as pltpu


def _round_up(a, b):
    return (a + b - 1) // b * b


def _pool_kernel(x_ref, sum_ref):
    # x_ref block: (1, C, hw_tile). Accumulate spatial sums in f32; the output
    # block index is constant along the reduction axis, so it stays resident.
    @pl.when(pl.program_id(1) == 0)
    def _():
        sum_ref[...] = jnp.zeros_like(sum_ref)

    sum_ref[...] += jnp.sum(x_ref[...].astype(jnp.float32), axis=-1,
                            keepdims=True)


def _scale_kernel(x_ref, s_ref, o_ref):
    # Pure broadcast multiply in the native dtype: (1, C, hw_tile) * (1, C, 1).
    o_ref[...] = x_ref[...] * s_ref[...]


def seq_ex_block(x, w1, b1, w2, b2, *, hw_tile_bytes=2 * 1024 * 1024):
    """Squeeze-and-Excitation forward.  x: (B, C, H, W) NCHW -> (B, C, H, W)."""
    B, C, H, W = x.shape
    HW = H * W
    itemsize = jnp.dtype(x.dtype).itemsize

    # Lane-dense spatial tile: multiple of 128, sized so one (1, C, hw_tile)
    # block is ~1-2 MiB (double-buffered input + output << 32/64 MiB VMEM).
    hw_tile = max(128, (hw_tile_bytes // (C * itemsize)) // 128 * 128)
    hw_tile = min(hw_tile, _round_up(HW, 128))
    HWp = _round_up(HW, hw_tile)
    n_hw = HWp // hw_tile

    x_flat = x.reshape(B, C, HW)
    if HWp != HW:
        # Zero-pad the spatial axis: zeros contribute 0 to the sum and the
        # padded columns are sliced off after the rescale.
        x_flat = jnp.pad(x_flat, ((0, 0), (0, 0), (0, HWp - HW)))

    # --- Kernel 1: spatial sum reduction (f32 accumulator) -------------------
    sums = pl.pallas_call(
        _pool_kernel,
        out_shape=jax.ShapeDtypeStruct((B, C, 1), jnp.float32),
        grid_spec=pltpu.PrefetchScalarGridSpec(
            num_scalar_prefetch=0,
            grid=(B, n_hw),
            in_specs=[pl.BlockSpec((1, C, hw_tile), lambda b, t: (b, 0, t))],
            out_specs=pl.BlockSpec((1, C, 1), lambda b, t: (b, 0, 0)),
        ),
        compiler_params=pltpu.CompilerParams(
            dimension_semantics=("parallel", "arbitrary")),
    )(x_flat)

    # --- SE gate (B*C-sized, negligible): plain JAX ---------------------------
    pooled = sums[..., 0] / jnp.float32(HW)                         # (B, C) f32
    h = jnp.maximum(pooled @ w1.astype(jnp.float32).T
                    + b1.astype(jnp.float32), 0.0)                  # (B, C//r)
    gate = jax.nn.sigmoid(h @ w2.astype(jnp.float32).T
                          + b2.astype(jnp.float32))                 # (B, C)
    gate = gate.astype(x.dtype).reshape(B, C, 1)

    # --- Kernel 2: channel-wise rescale (memory-bound broadcast multiply) -----
    out_flat = pl.pallas_call(
        _scale_kernel,
        out_shape=jax.ShapeDtypeStruct((B, C, HWp), x.dtype),
        grid_spec=pltpu.PrefetchScalarGridSpec(
            num_scalar_prefetch=0,
            grid=(B, n_hw),
            in_specs=[
                pl.BlockSpec((1, C, hw_tile), lambda b, t: (b, 0, t)),
                pl.BlockSpec((1, C, 1), lambda b, t: (b, 0, 0)),
            ],
            out_specs=pl.BlockSpec((1, C, hw_tile), lambda b, t: (b, 0, t)),
        ),
        compiler_params=pltpu.CompilerParams(
            dimension_semantics=("parallel", "parallel")),
    )(x_flat, gate)

    if HWp != HW:
        out_flat = out_flat[:, :, :HW]
    return out_flat.reshape(B, C, H, W)


def _reference(x, w1, b1, w2, b2):
    # Pure-JAX reference mirroring the PyTorch forward.
    B, C, H, W = x.shape
    pooled = x.reshape(B, C, H * W).mean(-1)              # (B, C)
    h = jax.nn.relu(pooled @ w1.T + b1)                   # (B, C//r)
    s = jax.nn.sigmoid(h @ w2.T + b2)                     # (B, C)
    return x * s[:, :, None, None]


if __name__ == "__main__":
    r = 16
    key = jax.random.PRNGKey(0)

    # Case 1: lane-aligned spatial dims (16x16 = 256).
    B, C, H, W = 2, 64, 16, 16
    hidden = C // r
    kx, k1, k2, k3, k4, kx2 = jax.random.split(key, 6)

    x = jax.random.normal(kx, (B, C, H, W), dtype=jnp.float32)
    # PyTorch Linear shapes: weight (out, in), bias (out,).
    w1 = jax.random.normal(k1, (hidden, C), dtype=jnp.float32) * 0.1
    b1 = jax.random.normal(k2, (hidden,), dtype=jnp.float32) * 0.1
    w2 = jax.random.normal(k3, (C, hidden), dtype=jnp.float32) * 0.1
    b2 = jax.random.normal(k4, (C,), dtype=jnp.float32) * 0.1

    out = jax.block_until_ready(seq_ex_block(x, w1, b1, w2, b2))
    ref = _reference(x, w1, b1, w2, b2)
    assert out.shape == (B, C, H, W)
    assert jnp.allclose(out, ref, atol=1e-5, rtol=1e-5)

    # Case 2: non-multiple-of-128 spatial dims (7x7 = 49) exercises padding.
    H2 = W2 = 7
    x2 = jax.random.normal(kx2, (B, C, H2, W2), dtype=jnp.float32)
    out2 = jax.block_until_ready(seq_ex_block(x2, w1, b1, w2, b2))
    ref2 = _reference(x2, w1, b1, w2, b2)
    assert out2.shape == (B, C, H2, W2)
    assert jnp.allclose(out2, ref2, atol=1e-5, rtol=1e-5)

    print("KERNEL_OK")
</pallas_src>

<mosaic_0001>
module attributes {stable_mosaic.version = 11 : i64} {
  func.func @_pool_kernel(%arg0: i32, %arg1: i32, %arg2: memref<1x64x256xf32, #tpu.memory_space<vmem>>, %arg3: memref<1x64x1xf32, #tpu.memory_space<vmem>>) attributes {dimension_semantics = [#tpu.dimension_semantics<parallel>, #tpu.dimension_semantics<arbitrary>], iteration_bounds = array<i64: 2, 1>, scalar_prefetch = 0 : i64, scratch_operands = 0 : i64, tpu.core_type = #tpu.core_type<tc>, window_params = [{transform_indices = @transform_0, window_bounds = array<i64: 1, 64, 256>}, {transform_indices = @transform_1, window_bounds = array<i64: 1, 64, 1>}]} {
    %c0_i32 = arith.constant 0 : i32
    %0 = arith.cmpi eq, %arg1, %c0_i32 : i32
    %1 = arith.extui %0 : i1 to i32
    %c0_i32_0 = arith.constant 0 : i32
    %2 = arith.cmpi ne, %1, %c0_i32_0 : i32
    scf.if %2 {
      %cst_9 = arith.constant 0.000000e+00 : f32
      %9 = vector.broadcast %cst_9 : f32 to vector<1x64x1xf32>
      %c0_10 = arith.constant 0 : index
      %c0_11 = arith.constant 0 : index
      %c0_12 = arith.constant 0 : index
      %10 = vector.load %arg3[%c0_10, %c0_11, %c0_12] : memref<1x64x1xf32, #tpu.memory_space<vmem>>, vector<1x64x1xf32>
      tpu.vector_store %arg3[%c0_10, %c0_11, %c0_12], %9 {strides = array<i32>} : memref<1x64x1xf32, #tpu.memory_space<vmem>>, vector<1x64x1xf32>,
    } else {
    }
    %c0 = arith.constant 0 : index
    %c0_1 = arith.constant 0 : index
    %c0_2 = arith.constant 0 : index
    %3 = vector.load %arg3[%c0, %c0_1, %c0_2] : memref<1x64x1xf32, #tpu.memory_space<vmem>>, vector<1x64x1xf32>
    %c0_3 = arith.constant 0 : index
    %c0_4 = arith.constant 0 : index
    %c0_5 = arith.constant 0 : index
    %4 = vector.load %arg2[%c0_3, %c0_4, %c0_5] : memref<1x64x256xf32, #tpu.memory_space<vmem>>, vector<1x64x256xf32>
    %cst = arith.constant dense<0.000000e+00> : vector<1x64xf32>
    %5 = vector.multi_reduction <add>, %4, %cst [2] : vector<1x64x256xf32> to vector<1x64xf32>
    %6 = vector.shape_cast %5 : vector<1x64xf32> to vector<1x64x1xf32>
    %7 = arith.addf %3, %6 : vector<1x64x1xf32>
    %c0_6 = arith.constant 0 : index
    %c0_7 = arith.constant 0 : index
    %c0_8 = arith.constant 0 : index
    %8 = vector.load %arg3[%c0_6, %c0_7, %c0_8] : memref<1x64x1xf32, #tpu.memory_space<vmem>>, vector<1x64x1xf32>
    tpu.vector_store %arg3[%c0_6, %c0_7, %c0_8], %7 {strides = array<i32>} : memref<1x64x1xf32, #tpu.memory_space<vmem>>, vector<1x64x1xf32>,
    return
  }
  func.func @transform_0(%arg0: i32, %arg1: i32) -> (i32, i32, i32) {
    %c0_i32 = arith.constant 0 : i32
    %c0_i32_0 = arith.constant 0 : i32
    return %arg0, %c0_i32, %arg1 : i32, i32, i32
  }
  func.func @transform_1(%arg0: i32, %arg1: i32) -> (i32, i32, i32) {
    %c0_i32 = arith.constant 0 : i32
    %c0_i32_0 = arith.constant 0 : i32
    %c0_i32_1 = arith.constant 0 : i32
    return %arg0, %c0_i32, %c0_i32_0 : i32, i32, i32
  }
}

</mosaic_0001>

<bundles_post_ra>
// kernel: tpu_custom_call.1
= control target key start
LH: loop header
LB: loop body
LE: loop exit
PB: predicated region body
PF: predicated region fallthrough
CT: control target
= control target key end

     0   :  { %6 = vsyncpa [#allocation3], 0  ;;  %s628_s0 = inlined_call_operand.hbm [shape: f32[2,64,256], index: 0, kind: input, shape index: {}]   ;;  %s629_s1 = inlined_call_operand.vmem [shape: f32[2,64,1], index: 1, kind: output, shape index: {}]  }
   0x1   :  { %8 = vsyncpa [#allocation3 + $0x1], 0  ;;  %s480_s6 = smov 0   ;;  %s482_s7 = smov 0  }
   0x2   :  { %s484_s8 = smov 0   ;;  %s486_s9 = smov 0  }
   0x3   :  { %s488_s10 = smov 0   ;;  %s490_s11 = smov 0  }
   0x4 LB: > { %s312_s12 = sadd.s32 4294967295, %s465_s11   ;;  %s26_s13 = sadd.s32 1, %s461_s10  ;;  %s465_s11 = sphi %s490_s11, %s14_s11   ;;  %s461_s10 = sphi %s488_s10, %s636_s10   ;;  %s457_s9 = sphi %s486_s9, %s635_s9   ;;  %s453_s8 = sphi %s484_s8, %s634_s8   ;;  %s449_s7 = sphi %s482_s7, %s633_s7   ;;  %s445_s6 = sphi %s480_s6, %s632_s6  }
   0x5   : > { %p28_p0 = scmp.ge.s32.totalorder %s26_s13, 2  ;;  %s35_s14 = sadd.s32 1, %s453_s8 }
   0x6   : > { %p42_p1 = scmp.ne.s32.totalorder %s453_s8, %s449_s7  ;;  %p43_p2 = scmp.eq.s32.totalorder %s465_s11, 0 }
   0x7   : > { %s638_s13 = smov (%p28_p0, %s26_s13), 0  ;;  %p48_p4 = scmp.ne.s32.totalorder %s449_s7, %s445_s6 }
   0x8   : > { %p516_p3 = por %p43_p2, %p42_p1  ;;  %s30_s16 = ssub.s32 %s461_s10, %s638_s13 }
   0x9   : > { %p49_p5 = scmp.eq.s32.totalorder %s312_s12, 0  ;;  %p33_p6 = scmp.eq.s32.totalorder %s30_s16, 0 }
   0xa   : > { %p333_p8 = scmp.lt.s32.totalorder %s465_s11, 2  ;;  %s98_s19 = sand.u32 1, %s453_s8  }
   0xb   : > { %p523_p7 = por %p49_p5, %p48_p4  ;;  %s325_s20 = sshll.u32 %s461_s10, 7 }
   0xc   : > { %s529_s18 = scalar_select %p33_p6, %s453_s8, %s35_s14  }
   0xd   : > { %s316_s21 = sshll.u32 %s98_s19, 7  ;;  %s109_s24 = scalar_lea.hbm %s628_s0, %s325_s20 }
   0xe   : > { %s110_s25 = sshll.u32 %s109_s24, 4  ;;  %s102_s26 = scalar_lea.vmem [#allocation2], %s316_s21  ;;  %s111_s25 = int_to_ptr.hbm [resolvable:$true] %s110_s25 }
   0xf   : > { %s112_s27 = sshll.u32 %s102_s26, 4  ;;  %p330_p9 = pnand %p333_p8, %p516_p3  ;;  %s113_s27 = int_to_ptr.vmem [resolvable:$true] %s112_s27 }
  0x10   : > { %p319_p10 = scmp.ge.s32.totalorder %s465_s11, 1  ;;  %p120_p11 = scmp.lt.s32.totalorder %s465_s11, 3 }
  0x11   : > { %s99_s28 = scalar_lea.sflag [#allocation3], %s98_s19  ;;  %s467_s29 = smov 256  }
  0x12   : > { %s468_s30 = smov 16   ;;  %p121_p12 = pnand %p319_p10, %p120_p11 }
  0x13   : > { %332 = dma.hbm_to_vmem [thread:$0]  (!%p330_p9), %s111_s25, 2048, %s113_s27, %s99_s28, %s467_s29, %s467_s29, %s468_s30  }
  0x14   : > { %124 = sbr.rel (%p121_p12) target bundleno = 165 (0xa5), region = 24  ;;  %s126_s2 = sand.u32 (!%p121_p12), 1, %s449_s7  }
  0x15   : > { %s320_s3 = sshll.u32 (!%p121_p12), %s126_s2, 7  ;;  %s127_s4 = scalar_lea.sflag (!%p121_p12), [#allocation3], %s126_s2 }
  0x16   : > { %s541_s5 = scalar_lea.vmem (!%p121_p12), [#allocation2], %s320_s3 }
  0x19   : > { %440 = dma.done.wait (%p523_p7), %s127_s4, 2048  }
  0x1a   : > { %442 = vsyncadd (%p523_p7), %s127_s4, 4294965248  ;;  %p151_p13 = scmp.lt.s32.totalorder %s457_s9, 1  ;;  %vm160_vm0 = vcmask 7168   ;;  %v469_v0 = vmov 0.0   ;;  %v181_v1 = vld [vmem:[%s541_s5 + $0x20] sm:$0xff]  ;;  %v182_v2 = vld [vmem:[%s541_s5 + $0x28] sm:$0xff] }
  0x1b   : > { %v177_v3 = vld [vmem:[%s541_s5] sm:$0xff]  ;;  %v199_v4 = vadd.f32 %v182_v2, %v181_v1  ;;  %v178_v5 = vld [vmem:[%s541_s5 + $0x8] sm:$0xff]  ;;  %v183_v10 = vld [vmem:[%s541_s5 + $0x30] sm:$0xff] }
  0x1c   : > { %s640_s9 = smov (!%p151_p13, %s457_s9), 1  ;;  %v185_v6 = vld [vmem:[%s541_s5 + $0x40] sm:$0xff]  ;;  %v186_v7 = vld [vmem:[%s541_s5 + $0x48] sm:$0xff]  ;;  %v193_v8 = vadd.f32 %v178_v5, %v177_v3  ;;  %v184_v11 = vld [vmem:[%s541_s5 + $0x38] sm:$0xff] }
  0x1d   : > { %s326_s6 = sshll.u32 %s640_s9, 6  ;;  %v205_v9 = vadd.f32 %v186_v7, %v185_v6  ;;  %200 = vadd.xlane.f32.xlu1 %v199_v4  ;;  %v179_v12 = vld [vmem:[%s541_s5 + $0x10] sm:$0xff]  ;;  %v180_v13 = vld [vmem:[%s541_s5 + $0x18] sm:$0xff]  ;;  %v202_v16 = vadd.f32 %v184_v11, %v183_v10  ;;  %v189_v21 = vld [vmem:[%s541_s5 + $0x60] sm:$0xff] }
  0x1e   : > { %s552_s15 = scalar_lea.vmem %s629_s1, %s326_s6  ;;  %194 = vadd.xlane.f32.xlu0 %v193_v8  ;;  %v187_v14 = vld [vmem:[%s541_s5 + $0x50] sm:$0xff]  ;;  %v188_v15 = vld [vmem:[%s541_s5 + $0x58] sm:$0xff]  ;;  %v196_v17 = vadd.f32 %v180_v13, %v179_v12  ;;  %v190_v22 = vld [vmem:[%s541_s5 + $0x68] sm:$0xff] }
  0x1f   : > { %163 = vst.msk [vmem:[%s552_s15 + $0x10] sm:$0xff] %vm160_vm0, %v469_v0  ;;  %206 = vadd.xlane.f32.xlu2 %v205_v9  ;;  %v208_v18 = vadd.f32 %v188_v15, %v187_v14  ;;  %v191_v19 = vld [vmem:[%s541_s5 + $0x70] sm:$0xff]  ;;  %v192_v20 = vld [vmem:[%s541_s5 + $0x78] sm:$0xff]  ;;  %v211_v24 = vadd.f32 %v190_v22, %v189_v21 }
  0x20   : > { %161 = vst.msk [vmem:[%s552_s15] sm:$0xff] %vm160_vm0, %v469_v0  ;;  %v214_v23 = vadd.f32 %v192_v20, %v191_v19 }
  0x21   : > { %162 = vst.msk [vmem:[%s552_s15 + $0x8] sm:$0xff] %vm160_vm0, %v469_v0 }
  0x22   : > { %164 = vst.msk [vmem:[%s552_s15 + $0x18] sm:$0xff] %vm160_vm0, %v469_v0 }
  0x23   : > { %165 = vst.msk [vmem:[%s552_s15 + $0x20] sm:$0xff] %vm160_vm0, %v469_v0 }
  0x24   : > { %166 = vst.msk [vmem:[%s552_s15 + $0x28] sm:$0xff] %vm160_vm0, %v469_v0 }
  0x25   : > { %167 = vst.msk [vmem:[%s552_s15 + $0x30] sm:$0xff] %vm160_vm0, %v469_v0  ;;  %203 = vadd.xlane.f32.xlu1 %v202_v16 }
  0x26   : > { %168 = vst.msk [vmem:[%s552_s15 + $0x38] sm:$0xff] %vm160_vm0, %v469_v0  ;;  %197 = vadd.xlane.f32.xlu0 %v196_v17  ;;  %v171_v25 = vld [vmem:[%s552_s15 + $0x10] sm:$0xff] }
  0x27   : > { %209 = vadd.xlane.f32.xlu2 %v208_v18  ;;  %v169_v26 = vld [vmem:[%s552_s15] sm:$0xff] }
  0x28   : > { %v170_v35 = vld [vmem:[%s552_s15 + $0x8] sm:$0xff] }
  0x29   : > { %v172_v34 = vld [vmem:[%s552_s15 + $0x18] sm:$0xff] }
  0x2a   : > { %v173_v27 = vld [vmem:[%s552_s15 + $0x20] sm:$0xff] }
  0x2b   : > { %v174_v36 = vld [vmem:[%s552_s15 + $0x28] sm:$0xff] }
  0x2c   : > { %v175_v44 = vld [vmem:[%s552_s15 + $0x30] sm:$0xff] }
  0x2d   : > { %215 = vadd.xlane.f32.xlu1 %v214_v23  ;;  %v176_v43 = vld [vmem:[%s552_s15 + $0x38] sm:$0xff] }
  0x2e   : > { %212 = vadd.xlane.f32.xlu0 %v211_v24 }
  0x90   : > { %v201_v28 = vpop.xlane.xlu1 %200 }
  0x91   : > { %v219_v29 = vadd.f32 %v201_v28, %v171_v25  ;;  %v195_v30 = vpop.xlane.xlu0 %194 }
  0x92   : > { %v207_v31 = vpop.xlane.xlu2 %206  ;;  %v217_v32 = vadd.f32 %v195_v30, %v169_v26 }
  0x93   : > { %v221_v33 = vadd.f32 %v207_v31, %v173_v27  ;;  %228 = vst.msk [vmem:[%s552_s15 + $0x10] sm:$0xff] %vm160_vm0, %v219_v29 }
  0x94   : > { %226 = vst.msk [vmem:[%s552_s15] sm:$0xff] %vm160_vm0, %v217_v32 }
  0x95   : > { %230 = vst.msk [vmem:[%s552_s15 + $0x20] sm:$0xff] %vm160_vm0, %v221_v33 }
  0x98   : > { %v204_v37 = vpop.xlane.xlu1 %203 }
  0x99   : > { %v220_v38 = vadd.f32 %v204_v37, %v172_v34  ;;  %v198_v39 = vpop.xlane.xlu0 %197 }
  0x9a   : > { %v210_v40 = vpop.xlane.xlu2 %209  ;;  %v218_v41 = vadd.f32 %v198_v39, %v170_v35 }
  0x9b   : > { %v222_v42 = vadd.f32 %v210_v40, %v174_v36  ;;  %229 = vst.msk [vmem:[%s552_s15 + $0x18] sm:$0xff] %vm160_vm0, %v220_v38 }
  0x9c   : > { %227 = vst.msk [vmem:[%s552_s15 + $0x8] sm:$0xff] %vm160_vm0, %v218_v41 }
  0x9d   : > { %231 = vst.msk [vmem:[%s552_s15 + $0x28] sm:$0xff] %vm160_vm0, %v222_v42 }
  0xa0   : > { %v216_v45 = vpop.xlane.xlu1 %215 }
  0xa1   : > { %v224_v46 = vadd.f32 %v216_v45, %v176_v43  ;;  %v213_v47 = vpop.xlane.xlu0 %212 }
  0xa2   : > { %v223_v48 = vadd.f32 %v213_v47, %v175_v44 }
  0xa3   : > { %233 = vst.msk [vmem:[%s552_s15 + $0x38] sm:$0xff] %vm160_vm0, %v224_v46 }
  0xa4   : > { %232 = vst.msk [vmem:[%s552_s15 + $0x30] sm:$0xff] %vm160_vm0, %v223_v48 }
  0xa5 PF: > { %s14_s11 = sadd.s32 1, %s465_s11   ;;  %s632_s6 = smov %s449_s7 }
  0xa6   : > { %p11_p0 = scmp.ge.s32.totalorder %s14_s11, 4   ;;  %s633_s7 = smov %s453_s8 }
  0xa7   : > { %s634_s8 = smov %s529_s18  ;;  %s635_s9 = smov %s461_s10 }
  0xa8   : > { %s636_s10 = smov %s638_s13  ;;  %13 = sbr.rel (!%p11_p0) target bundleno = 4 (0x4), region = 68 }
  0xad   :  { %255 = vsyncpa [#allocation3], 1 }
  0xae   :  { %257 = vsyncpa [#allocation3 + $0x1], 1 }

</bundles_post_ra>
